<compile_context>
chip_gen: v7x
topology: tpu7x:2x2x1
jax: 0.10.0
libtpu: 0.0.40
codegen_flags: <defaults>
</compile_context>

<pallas_src>
import jax
import jax.numpy as jnp
from jax import lax
from jax.experimental import pallas as pl
from jax.experimental.pallas import tpu as pltpu

embedding_size = 64


def _input_embeddings_kernel(ids_ref, table_ref, pos_ref, o_ref):
    # ids_ref:   (N, 1)      int32   flattened token ids (N = B*T)
    # table_ref: (V_pad, C)  f32     embedding table, vocab padded to mult. of 128
    # pos_ref:   (T, C)      f32     sinusoidal positional encoding
    # o_ref:     (N, C)      f32     output
    n_tok = ids_ref.shape[0]
    v_pad = table_ref.shape[0]
    seq_len = pos_ref.shape[0]

    ids = ids_ref[...]                                               # (N, 1)
    one_hot = lax.broadcasted_iota(jnp.int32, (n_tok, v_pad), 1) == ids
    # Embedding gather as a single lane-dense MXU matmul: (N, V_pad) @ (V_pad, C)
    emb = jnp.dot(one_hot.astype(table_ref.dtype), table_ref[...],
                  preferred_element_type=jnp.float32)                # (N, C)

    # Positional encoding: rows are ordered (b, t), so tile P across the batch.
    pos = jnp.tile(pos_ref[...], (n_tok // seq_len, 1))              # (N, C)

    o_ref[...] = (emb + pos).astype(o_ref.dtype)


def position_encoding(seq_len, d, n=10000.0):
    """Sinusoidal table: P[k, 2i] = sin(k / n^(2i/d)), P[k, 2i+1] = cos(...)."""
    k = jnp.arange(seq_len, dtype=jnp.float32)[:, None]              # (T, 1)
    i = jnp.arange(d // 2, dtype=jnp.float32)[None, :]               # (1, d/2)
    denom = jnp.power(jnp.float32(n), 2.0 * i / d)                   # (1, d/2)
    ang = k / denom                                                  # (T, d/2)
    # interleave sin/cos -> columns [sin0, cos0, sin1, cos1, ...]
    return jnp.stack([jnp.sin(ang), jnp.cos(ang)], axis=-1).reshape(seq_len, d)


def input_embeddings(token_ids, embedding_table, n=10000.0):
    """token_ids: (B, T) int; embedding_table: (V, C). Returns (B, T, C)."""
    B, T = token_ids.shape
    V, C = embedding_table.shape
    N = B * T

    # Constant positional table (depends only on T, C) — built once wrapper-side.
    pos = position_encoding(T, C, n).astype(embedding_table.dtype)

    # Pad vocab rows up to a multiple of 128 so the in-kernel one-hot matmul
    # contraction is lane-dense / unmasked. Padded rows are zero.
    v_pad = max(128, ((V + 127) // 128) * 128)
    table_p = jnp.zeros((v_pad, C), embedding_table.dtype).at[:V, :].set(embedding_table)

    ids_2d = token_ids.reshape(N, 1).astype(jnp.int32)

    out_flat = pl.pallas_call(
        _input_embeddings_kernel,
        out_shape=jax.ShapeDtypeStruct((N, C), embedding_table.dtype),
        grid_spec=pltpu.PrefetchScalarGridSpec(
            num_scalar_prefetch=0,
            grid=(1,),                                   # single step: whole problem in VMEM
            in_specs=[
                pl.BlockSpec((N, 1), lambda i: (0, 0)),        # token ids
                pl.BlockSpec((v_pad, C), lambda i: (0, 0)),    # padded embedding table
                pl.BlockSpec((T, C), lambda i: (0, 0)),        # positional encoding
            ],
            out_specs=pl.BlockSpec((N, C), lambda i: (0, 0)),
        ),
        compiler_params=pltpu.CompilerParams(
            dimension_semantics=("arbitrary",)),
    )(ids_2d, table_p, pos)

    return out_flat.reshape(B, T, C)


def _reference(token_ids, embedding_table, n=10000.0):
    """Pure-JAX reference mirroring the PyTorch forward."""
    B, T = token_ids.shape
    C = embedding_table.shape[1]
    P = position_encoding(T, C, n)
    return embedding_table[token_ids] + P[None]


if __name__ == "__main__":
    B, T = 2, 8
    C = embedding_size            # 64
    vocab_size = 65               # char-level vocab (as in minigpt)

    key = jax.random.PRNGKey(0)
    k_tok, k_emb = jax.random.split(key)

    token_ids = jax.random.randint(k_tok, (B, T), 0, vocab_size, dtype=jnp.int32)
    embedding_table = jax.random.normal(k_emb, (vocab_size, C), jnp.float32)

    out = input_embeddings(token_ids, embedding_table)
    out = jax.block_until_ready(out)

    ref = _reference(token_ids, embedding_table)
    assert out.shape == (B, T, C)
    assert jnp.allclose(out, ref, atol=1e-5, rtol=1e-5), "mismatch vs reference"

    print("KERNEL_OK")
</pallas_src>

<mosaic_0001>
module attributes {stable_mosaic.version = 11 : i64} {
  func.func @_input_embeddings_kernel(%arg0: i32, %arg1: memref<16x1xi32, #tpu.memory_space<vmem>>, %arg2: memref<128x64xf32, #tpu.memory_space<vmem>>, %arg3: memref<8x64xf32, #tpu.memory_space<vmem>>, %arg4: memref<16x64xf32, #tpu.memory_space<vmem>>) attributes {dimension_semantics = [#tpu.dimension_semantics<arbitrary>], iteration_bounds = array<i64: 1>, scalar_prefetch = 0 : i64, scratch_operands = 0 : i64, tpu.core_type = #tpu.core_type<tc>, window_params = [{pipeline_mode = #tpu.pipeline_mode<synchronous>, transform_indices = @transform_0, window_bounds = array<i64: 16, 1>}, {pipeline_mode = #tpu.pipeline_mode<synchronous>, transform_indices = @transform_1, window_bounds = array<i64: 128, 64>}, {pipeline_mode = #tpu.pipeline_mode<synchronous>, transform_indices = @transform_2, window_bounds = array<i64: 8, 64>}, {pipeline_mode = #tpu.pipeline_mode<synchronous>, transform_indices = @transform_3, window_bounds = array<i64: 16, 64>}]} {
    %c0 = arith.constant 0 : index
    %c0_0 = arith.constant 0 : index
    %0 = vector.load %arg1[%c0, %c0_0] : memref<16x1xi32, #tpu.memory_space<vmem>>, vector<16x1xi32>
    %1 = tpu.iota {dimensions = array<i32: 1>} : vector<16x128xi32>
    %2 = vector.broadcast %0 : vector<16x1xi32> to vector<16x128xi32>
    %3 = arith.cmpi eq, %1, %2 : vector<16x128xi32>
    %4 = arith.extui %3 : vector<16x128xi1> to vector<16x128xi32>
    %5 = arith.sitofp %4 : vector<16x128xi32> to vector<16x128xf32>
    %c0_1 = arith.constant 0 : index
    %c0_2 = arith.constant 0 : index
    %6 = vector.load %arg2[%c0_1, %c0_2] : memref<128x64xf32, #tpu.memory_space<vmem>>, vector<128x64xf32>
    %cst = arith.constant dense<0.000000e+00> : vector<16x64xf32>
    %7 = tpu.matmul %5, %6, %cst {dimension_numbers = #tpu.dot_dimension_numbers<[1], [0], [0], [1], [0, 0, 1, 1], [], []>} : vector<16x128xf32>, vector<128x64xf32>, vector<16x64xf32> -> vector<16x64xf32>
    %c0_3 = arith.constant 0 : index
    %c0_4 = arith.constant 0 : index
    %8 = vector.load %arg3[%c0_3, %c0_4] : memref<8x64xf32, #tpu.memory_space<vmem>>, vector<8x64xf32>
    %9 = tpu.concatenate %8, %8 in 0 : vector<8x64xf32>, vector<8x64xf32> -> vector<16x64xf32>
    %10 = arith.addf %7, %9 : vector<16x64xf32>
    %c0_5 = arith.constant 0 : index
    %c0_6 = arith.constant 0 : index
    %11 = vector.load %arg4[%c0_5, %c0_6] : memref<16x64xf32, #tpu.memory_space<vmem>>, vector<16x64xf32>
    tpu.vector_store %arg4[%c0_5, %c0_6], %10 {strides = array<i32>} : memref<16x64xf32, #tpu.memory_space<vmem>>, vector<16x64xf32>,
    return
  }
  func.func @transform_0(%arg0: i32) -> (i32, i32) {
    %c0_i32 = arith.constant 0 : i32
    %c0_i32_0 = arith.constant 0 : i32
    %c0_i32_1 = arith.constant 0 : i32
    return %c0_i32, %c0_i32_0 : i32, i32
  }
  func.func @transform_1(%arg0: i32) -> (i32, i32) {
    %c0_i32 = arith.constant 0 : i32
    %c0_i32_0 = arith.constant 0 : i32
    %c0_i32_1 = arith.constant 0 : i32
    return %c0_i32, %c0_i32_0 : i32, i32
  }
  func.func @transform_2(%arg0: i32) -> (i32, i32) {
    %c0_i32 = arith.constant 0 : i32
    %c0_i32_0 = arith.constant 0 : i32
    %c0_i32_1 = arith.constant 0 : i32
    return %c0_i32, %c0_i32_0 : i32, i32
  }
  func.func @transform_3(%arg0: i32) -> (i32, i32) {
    %c0_i32 = arith.constant 0 : i32
    %c0_i32_0 = arith.constant 0 : i32
    %c0_i32_1 = arith.constant 0 : i32
    return %c0_i32, %c0_i32_0 : i32, i32
  }
}

</mosaic_0001>

<bundles_post_ra>
// kernel: tpu_custom_call.1
= control target key start
LH: loop header
LB: loop body
LE: loop exit
PB: predicated region body
PF: predicated region fallthrough
CT: control target
= control target key end

     0   :  { %v261_v2 = vmov 0   ;;  %s355_s0 = inlined_call_operand.vmem [shape: s32[16,1], index: 0, kind: input, shape index: {}]   ;;  %s356_s1 = inlined_call_operand.vmem [shape: f32[128,64], index: 1, kind: input, shape index: {}]   ;;  %s357_s2 = inlined_call_operand.vmem [shape: f32[8,64], index: 2, kind: input, shape index: {}]   ;;  %s358_s3 = inlined_call_operand.hbm [shape: f32[16,64], index: 3, kind: output, shape index: {}]  }
   0x1   :  { %v15_v0 = vld [vmem:[%s355_s0] sm:$0xff]  ;;  %236 = vset.pattern.permute.xlu0 %v261_v2  ;;  %v32_v3 = vld [vmem:[%s356_s1 + $0x8] sm:$0xff]  ;;  %v33_v4 = vld [vmem:[%s356_s1 + $0x10] sm:$0xff] }
   0x2   :  { %v31_v1 = vld [vmem:[%s356_s1] sm:$0xff]  ;;  %v34_v5 = vld [vmem:[%s356_s1 + $0x18] sm:$0xff]  ;;  %20 = vperm.xlu0 %236, %v15_v0   ;;  %v16_v8 = vld [vmem:[%s355_s0 + $0x8] sm:$0xff] }
   0x3   :  { %v199_v6 = vpack.c.bf16 %v32_v3, %v31_v1  ;;  %v203_v7 = vpack.c.bf16 %v34_v5, %v33_v4  ;;  %v35_v9 = vld [vmem:[%s356_s1 + $0x20] sm:$0xff]  ;;  %v36_v10 = vld [vmem:[%s356_s1 + $0x28] sm:$0xff] }
   0x4   :  { %v207_v11 = vpack.c.bf16 %v36_v10, %v35_v9 }
   0x5   :  { %200 = vmatprep.subr.bf16.mxu0 %v199_v6 }
   0x6   :  { %202 = vmatpush3.bf16.msra.mxu0 %v199_v6  ;;  %23 = vperm.xlu0 %236, %v16_v8  }
   0x7   :  { %204 = vmatprep.subr.bf16.mxu0 %v203_v7 }
   0x8   :  { %8 = vsyncpa [#allocation3], 0  ;;  %v37_v12 = vld [vmem:[%s356_s1 + $0x30] sm:$0xff]  ;;  %v38_v13 = vld [vmem:[%s356_s1 + $0x38] sm:$0xff]  ;;  %v17_v27 = vlaneseq  ;;  %v262_v30 = vmov 1.0   ;;  %vm123_vm2 = vcmask 523264  }
   0x9   :  { %v211_v14 = vpack.c.bf16 %v38_v13, %v37_v12  ;;  %v39_v15 = vld [vmem:[%s356_s1 + $0x40] sm:$0xff]  ;;  %v40_v16 = vld [vmem:[%s356_s1 + $0x48] sm:$0xff]  ;;  %v41_v18 = vld [vmem:[%s356_s1 + $0x50] sm:$0xff] }
   0xa   :  { %206 = vmatpush3.bf16.msra.mxu0 %v203_v7  ;;  %v215_v17 = vpack.c.bf16 %v40_v16, %v39_v15  ;;  %v42_v19 = vld [vmem:[%s356_s1 + $0x58] sm:$0xff]  ;;  %v43_v21 = vld [vmem:[%s356_s1 + $0x60] sm:$0xff]  ;;  %v44_v22 = vld [vmem:[%s356_s1 + $0x68] sm:$0xff]  ;;  %v18_v28 = vand.u32 127, %v17_v27 }
   0xb   :  { %208 = vmatprep.subr.bf16.mxu0 %v207_v11  ;;  %v219_v20 = vpack.c.bf16 %v42_v19, %v41_v18  ;;  %v223_v23 = vpack.c.bf16 %v44_v22, %v43_v21  ;;  %v45_v24 = vld [vmem:[%s356_s1 + $0x70] sm:$0xff]  ;;  %v46_v25 = vld [vmem:[%s356_s1 + $0x78] sm:$0xff]  ;;  %v47_v32 = vld [vmem:[%s357_s2] sm:$0xff]  ;;  %s263_s1 = smov [#allocation2]  }
   0xc   :  { %v227_v26 = vpack.c.bf16 %v46_v25, %v45_v24  ;;  %s131_s22 = sshll.u32 %s263_s1, 4  ;;  %s132_s22 = int_to_ptr.vmem [resolvable:$true] %s131_s22 }
   0xd   :  { %s237_s23 = scalar_lea.vmem %s132_s22, 256  ;;  %p242_p1 = scmp.lt.s32.totalorder %s132_s22, %s132_s22 }
   0xe   :  { %210 = vmatpush3.bf16.msra.mxu0 %v207_v11  ;;  %p238_p0 = scmp.ne.s32.totalorder %s132_s22, %s237_s23  ;;  %p243_p2 = scmp.lt.s32.totalorder %s237_s23, %s237_s23 }
   0xf   :  { %212 = vmatprep.subr.bf16.mxu0 %v211_v14 }
  0x10   :  { %p244_p3 = por %p243_p2, %p242_p1 }
  0x12   :  { %214 = vmatpush3.bf16.msra.mxu0 %v211_v14  ;;  %p245_p4 = pnand %p244_p3, %p238_p0 }
  0x13   :  { %216 = vmatprep.subr.bf16.mxu0 %v215_v17 }
  0x16   :  { %218 = vmatpush3.bf16.msra.mxu0 %v215_v17 }
  0x17   :  { %220 = vmatprep.subr.bf16.mxu0 %v219_v20 }
  0x1a   :  { %222 = vmatpush3.bf16.msra.mxu0 %v219_v20 }
  0x1b   :  { %224 = vmatprep.subr.bf16.mxu0 %v223_v23 }
  0x1e   :  { %226 = vmatpush3.bf16.msra.mxu0 %v223_v23 }
  0x1f   :  { %228 = vmatprep.subr.bf16.mxu0 %v227_v26 }
  0x22   :  { %230 = vmatpush3.bf16.msra.mxu0 %v227_v26 }
  0x81   :  { %v21_v29 = vpop.permute.xlu0 %20 }
  0x82   :  { %vm25_vm0 = vcmp.eq.s32.totalorder %v18_v28, %v21_v29 }
  0x83   :  { %196 = vmatprep.mubr.msk.f32.mxu0 %vm25_vm0, %v262_v30 }
  0x85   :  { %v24_v31 = vpop.permute.xlu0 %23 }
  0x86   :  { %vm26_vm1 = vcmp.eq.s32.totalorder %v18_v28, %v24_v31 }
  0x87   :  { %197 = vmatmul.mubr.msk.f32.vlgmr.msra.gmra.mrb[0].mxu0 %vm26_vm1, %v262_v30 }
 0x15a   :  { %v198_v33 = vpop.f32.mrb[0].mxu0 }
 0x15b   :  { %v120_v34 = vadd.f32 %v198_v33, %v47_v32  ;;  %v114_v35 = vpop.f32.mrb[1].mxu0 }
 0x15c   :  { %v115_v36 = vadd.f32 %v114_v35, %v47_v32 }
 0x15d   :  { %125 = vst.msk [vmem:[#allocation2 + $0x8] sm:$0xff] %vm123_vm2, %v120_v34 }
 0x15e   :  { %124 = vst.msk [vmem:[#allocation2] sm:$0xff] %vm123_vm2, %v115_v36 }
 0x15f   :  { %248 = shalt.err (!%p245_p4)
}
 0x160   :  { %s249_s2 = scalar_lea.hbm %s358_s3, 256 }
 0x161   :  { %p250_p5 = scmp.ne.s32.totalorder %s358_s3, %s249_s2  ;;  %p253_p6 = scmp.lt.u32.totalorder %s249_s2, %s358_s3 }
 0x163   :  { %p255_p7 = pnand %p253_p6, %p250_p5 }
 0x165   :  { %258 = shalt.err (!%p255_p7)
}
 0x166   :  { %s264_s30 = smov 128   ;;  %s265_s0 = smov 8  }
 0x167   :  { %137 = dma.vmem_to_hbm [thread:$0]  %s132_s22, 256, %s358_s3, [#allocation3], %s264_s30, %s264_s30, %s265_s0  }
 0x168   :  { %259 = dma.done.wait [#allocation3], 256  }
 0x169   :  { %260 = vsyncadd [#allocation3], 4294967040 }
 0x16a   :  { %141 = vsyncpa [#allocation3], 1 }

</bundles_post_ra>
